<compile_context>
chip_gen: v7x
topology: tpu7x:2x2x1
jax: 0.10.0
libtpu: 0.0.40
codegen_flags: <defaults>
</compile_context>

<pallas_src>
import functools

import jax
import jax.numpy as jnp
from jax.experimental import pallas as pl
from jax.experimental.pallas import tpu as pltpu

EPS = 1e-5


# ----------------------------- Pallas kernels -----------------------------

def _style_proj_kernel(s_ref, w_ref, b_ref, o_ref):
    # nn.Linear(w_dim, 2C):  [B, wdim] @ [wdim, 2C] + bias  (tiny, one MXU push).
    o_ref[...] = (
        jnp.dot(s_ref[...], w_ref[...], preferred_element_type=jnp.float32)
        + b_ref[...]
    )


def _adain_kernel(x_ref, g_ref, b_ref, o_ref):
    # x_ref: (1, TC, N) — channels on sublanes, points on lanes (lane-dense).
    # g_ref/b_ref: (1, TC, 1) per-(batch, channel) gamma/beta.
    x = x_ref[0]                                                   # [TC, N]
    # InstanceNorm1d: per-(batch, channel) stats over points, biased var.
    mean = jnp.mean(x, axis=1, keepdims=True)                      # XLU reduce
    var = jnp.mean((x - mean) ** 2, axis=1, keepdims=True)
    xn = (x - mean) * jax.lax.rsqrt(var + EPS)
    o_ref[0] = g_ref[0] * xn + b_ref[0]


# ------------------------------ wrappers -----------------------------------

def _pick_channel_tile(C, N, budget_bytes=2 * 1024 * 1024):
    """Channel tile: full C if not 8-divisible, else a multiple-of-8 divisor
    keeping the (1, tc, N) f32 block under ~2 MiB (pipelining headroom)."""
    if C % 8 != 0:
        return C
    budget_rows = max(8, budget_bytes // (4 * N))
    for cand in (256, 128, 64, 32, 16, 8):
        if C % cand == 0 and cand <= budget_rows:
            return min(cand, C)
    return C


def style_projection(style, style_w, style_b):
    """style: [B, w_dim] -> [B, 2C] (gamma ++ beta)."""
    B, _ = style.shape
    two_c = style_w.shape[1]
    return pl.pallas_call(
        _style_proj_kernel,
        out_shape=jax.ShapeDtypeStruct((B, two_c), jnp.float32),
    )(style, style_w, style_b.reshape(1, two_c))


def adaptive_instance_norm(content, style, style_w, style_b):
    """content: [B, C, N] (PyTorch NCW), style: [B, w_dim] -> [B, C, N]."""
    B, C, N = content.shape

    # 1) style Linear, hoisted out of the normalization grid (runs once).
    gb = style_projection(style, style_w, style_b)                 # [B, 2C]
    gamma = gb[:, :C].reshape(B, C, 1)
    beta = gb[:, C:].reshape(B, C, 1)

    # 2) instance-norm + modulation, tiled over (batch, channel-tile).
    tc = _pick_channel_tile(C, N)
    grid = (B, C // tc)
    return pl.pallas_call(
        _adain_kernel,
        out_shape=jax.ShapeDtypeStruct((B, C, N), jnp.float32),
        grid=grid,
        in_specs=[
            pl.BlockSpec((1, tc, N), lambda b, c: (b, c, 0)),
            pl.BlockSpec((1, tc, 1), lambda b, c: (b, c, 0)),
            pl.BlockSpec((1, tc, 1), lambda b, c: (b, c, 0)),
        ],
        out_specs=pl.BlockSpec((1, tc, N), lambda b, c: (b, c, 0)),
        compiler_params=pltpu.CompilerParams(
            dimension_semantics=("parallel", "parallel")),
    )(content, gamma, beta)


# --------------------------- pure-JAX reference -----------------------------

def adain_ref(content, style, style_w, style_b):
    gb = style @ style_w + style_b
    C = content.shape[1]
    gamma = gb[:, :C][:, :, None]
    beta = gb[:, C:][:, :, None]
    mean = content.mean(axis=2, keepdims=True)
    var = ((content - mean) ** 2).mean(axis=2, keepdims=True)
    return gamma * (content - mean) / jnp.sqrt(var + EPS) + beta


# ---------------------------------- main ------------------------------------

if __name__ == "__main__":
    B, C, N, W_DIM = 2, 4, 256, 16

    key = jax.random.PRNGKey(0)
    k_content, k_style, k_w = jax.random.split(key, 3)

    content = jax.random.normal(k_content, (B, C, N), dtype=jnp.float32)
    style = jax.random.normal(k_style, (B, W_DIM), dtype=jnp.float32)

    # Linear(w_dim, 2C) params; bias init as in the module: gamma half = 1,
    # beta half = 0.  style_w here is W.T ([w_dim, 2C]).
    style_w = 0.1 * jax.random.normal(k_w, (W_DIM, 2 * C), dtype=jnp.float32)
    style_b = jnp.concatenate(
        [jnp.ones((C,), jnp.float32), jnp.zeros((C,), jnp.float32)])

    fwd = jax.jit(adaptive_instance_norm)
    out = fwd(content, style, style_w, style_b)
    jax.block_until_ready(out)

    ref = adain_ref(content, style, style_w, style_b)
    assert out.shape == (B, C, N), out.shape
    assert bool(jnp.all(jnp.isfinite(out)))
    max_err = float(jnp.max(jnp.abs(out - ref)))
    assert max_err < 1e-4, f"mismatch vs reference: {max_err}"

    print("KERNEL_OK")
</pallas_src>

<mosaic_0001>
module attributes {stable_mosaic.version = 11 : i64} {
  func.func @_style_proj_kernel(%arg0: memref<2x16xf32, #tpu.memory_space<vmem>>, %arg1: memref<16x8xf32, #tpu.memory_space<vmem>>, %arg2: memref<1x8xf32, #tpu.memory_space<vmem>>, %arg3: memref<2x8xf32, #tpu.memory_space<vmem>>) attributes {dimension_semantics = [], scalar_prefetch = 0 : i64, scratch_operands = 0 : i64, tpu.core_type = #tpu.core_type<tc>} {
    %c0 = arith.constant 0 : index
    %c0_0 = arith.constant 0 : index
    %0 = vector.load %arg0[%c0, %c0_0] : memref<2x16xf32, #tpu.memory_space<vmem>>, vector<2x16xf32>
    %c0_1 = arith.constant 0 : index
    %c0_2 = arith.constant 0 : index
    %1 = vector.load %arg1[%c0_1, %c0_2] : memref<16x8xf32, #tpu.memory_space<vmem>>, vector<16x8xf32>
    %cst = arith.constant dense<0.000000e+00> : vector<2x8xf32>
    %2 = tpu.matmul %0, %1, %cst {dimension_numbers = #tpu.dot_dimension_numbers<[1], [0], [0], [1], [0, 0, 1, 1], [], []>} : vector<2x16xf32>, vector<16x8xf32>, vector<2x8xf32> -> vector<2x8xf32>
    %c0_3 = arith.constant 0 : index
    %c0_4 = arith.constant 0 : index
    %3 = vector.load %arg2[%c0_3, %c0_4] : memref<1x8xf32, #tpu.memory_space<vmem>>, vector<1x8xf32>
    %4 = vector.broadcast %3 : vector<1x8xf32> to vector<2x8xf32>
    %5 = arith.addf %2, %4 : vector<2x8xf32>
    %c0_5 = arith.constant 0 : index
    %c0_6 = arith.constant 0 : index
    %6 = vector.load %arg3[%c0_5, %c0_6] : memref<2x8xf32, #tpu.memory_space<vmem>>, vector<2x8xf32>
    tpu.vector_store %arg3[%c0_5, %c0_6], %5 {strides = array<i32>} : memref<2x8xf32, #tpu.memory_space<vmem>>, vector<2x8xf32>,
    return
  }
}

module attributes {stable_mosaic.version = 11 : i64} {
  func.func @_adain_kernel(%arg0: i32, %arg1: i32, %arg2: memref<1x4x256xf32, #tpu.memory_space<vmem>>, %arg3: memref<1x4x1xf32, #tpu.memory_space<vmem>>, %arg4: memref<1x4x1xf32, #tpu.memory_space<vmem>>, %arg5: memref<1x4x256xf32, #tpu.memory_space<vmem>>) attributes {dimension_semantics = [#tpu.dimension_semantics<parallel>, #tpu.dimension_semantics<parallel>], iteration_bounds = array<i64: 2, 1>, scalar_prefetch = 0 : i64, scratch_operands = 0 : i64, tpu.core_type = #tpu.core_type<tc>, window_params = [{transform_indices = @transform_0, window_bounds = array<i64: 1, 4, 256>}, {transform_indices = @transform_1, window_bounds = array<i64: 1, 4, 1>}, {transform_indices = @transform_2, window_bounds = array<i64: 1, 4, 1>}, {transform_indices = @transform_3, window_bounds = array<i64: 1, 4, 256>}]} {
    %c0 = arith.constant 0 : index
    %c0_0 = arith.constant 0 : index
    %c0_1 = arith.constant 0 : index
    %0 = vector.load %arg2[%c0, %c0_0, %c0_1] : memref<1x4x256xf32, #tpu.memory_space<vmem>>, vector<1x4x256xf32>
    %1 = vector.shape_cast %0 : vector<1x4x256xf32> to vector<4x256xf32>
    %cst = arith.constant dense<0.000000e+00> : vector<4xf32>
    %2 = vector.multi_reduction <add>, %1, %cst [1] : vector<4x256xf32> to vector<4xf32>
    %3 = vector.shape_cast %2 : vector<4xf32> to vector<4x1xf32>
    %cst_2 = arith.constant 2.560000e+02 : f32
    %4 = vector.broadcast %cst_2 : f32 to vector<4x1xf32>
    %5 = arith.divf %3, %4 : vector<4x1xf32>
    %6 = vector.broadcast %5 : vector<4x1xf32> to vector<4x256xf32>
    %7 = arith.subf %1, %6 : vector<4x256xf32>
    %8 = arith.mulf %7, %7 : vector<4x256xf32>
    %cst_3 = arith.constant dense<0.000000e+00> : vector<4xf32>
    %9 = vector.multi_reduction <add>, %8, %cst_3 [1] : vector<4x256xf32> to vector<4xf32>
    %10 = vector.shape_cast %9 : vector<4xf32> to vector<4x1xf32>
    %cst_4 = arith.constant 2.560000e+02 : f32
    %11 = vector.broadcast %cst_4 : f32 to vector<4x1xf32>
    %12 = arith.divf %10, %11 : vector<4x1xf32>
    %13 = vector.broadcast %5 : vector<4x1xf32> to vector<4x256xf32>
    %14 = arith.subf %1, %13 : vector<4x256xf32>
    %cst_5 = arith.constant 9.99999974E-6 : f32
    %15 = vector.broadcast %cst_5 : f32 to vector<4x1xf32>
    %16 = arith.addf %12, %15 : vector<4x1xf32>
    %17 = math.rsqrt %16 : vector<4x1xf32>
    %18 = vector.broadcast %17 : vector<4x1xf32> to vector<4x256xf32>
    %19 = arith.mulf %14, %18 : vector<4x256xf32>
    %c0_6 = arith.constant 0 : index
    %c0_7 = arith.constant 0 : index
    %c0_8 = arith.constant 0 : index
    %20 = vector.load %arg3[%c0_6, %c0_7, %c0_8] : memref<1x4x1xf32, #tpu.memory_space<vmem>>, vector<1x4x1xf32>
    %21 = vector.shape_cast %20 : vector<1x4x1xf32> to vector<4x1xf32>
    %22 = vector.broadcast %21 : vector<4x1xf32> to vector<4x256xf32>
    %23 = arith.mulf %22, %19 : vector<4x256xf32>
    %c0_9 = arith.constant 0 : index
    %c0_10 = arith.constant 0 : index
    %c0_11 = arith.constant 0 : index
    %24 = vector.load %arg4[%c0_9, %c0_10, %c0_11] : memref<1x4x1xf32, #tpu.memory_space<vmem>>, vector<1x4x1xf32>
    %25 = vector.shape_cast %24 : vector<1x4x1xf32> to vector<4x1xf32>
    %26 = vector.broadcast %25 : vector<4x1xf32> to vector<4x256xf32>
    %27 = arith.addf %23, %26 : vector<4x256xf32>
    %c0_12 = arith.constant 0 : index
    %c0_13 = arith.constant 0 : index
    %c0_14 = arith.constant 0 : index
    %28 = vector.load %arg5[%c0_12, %c0_13, %c0_14] : memref<1x4x256xf32, #tpu.memory_space<vmem>>, vector<1x4x256xf32>
    %29 = vector.shape_cast %28 : vector<1x4x256xf32> to vector<4x256xf32>
    %30 = vector.shape_cast %27 : vector<4x256xf32> to vector<1x4x256xf32>
    tpu.vector_store %arg5[%c0_12, %c0_13, %c0_14], %30 {strides = array<i32>} : memref<1x4x256xf32, #tpu.memory_space<vmem>>, vector<1x4x256xf32>,
    return
  }
  func.func @transform_0(%arg0: i32, %arg1: i32) -> (i32, i32, i32) {
    %c0_i32 = arith.constant 0 : i32
    %c0_i32_0 = arith.constant 0 : i32
    return %arg0, %arg1, %c0_i32 : i32, i32, i32
  }
  func.func @transform_1(%arg0: i32, %arg1: i32) -> (i32, i32, i32) {
    %c0_i32 = arith.constant 0 : i32
    %c0_i32_0 = arith.constant 0 : i32
    return %arg0, %arg1, %c0_i32 : i32, i32, i32
  }
  func.func @transform_2(%arg0: i32, %arg1: i32) -> (i32, i32, i32) {
    %c0_i32 = arith.constant 0 : i32
    %c0_i32_0 = arith.constant 0 : i32
    return %arg0, %arg1, %c0_i32 : i32, i32, i32
  }
  func.func @transform_3(%arg0: i32, %arg1: i32) -> (i32, i32, i32) {
    %c0_i32 = arith.constant 0 : i32
    %c0_i32_0 = arith.constant 0 : i32
    return %arg0, %arg1, %c0_i32 : i32, i32, i32
  }
}

</mosaic_0001>

<bundles_post_ra>
// kernel: adaptive_instance_norm.2
= control target key start
LH: loop header
LB: loop body
LE: loop exit
PB: predicated region body
PF: predicated region fallthrough
CT: control target
= control target key end

     0   :  { %v122_v0 = vmov 0.0|0.0   ;;  %vm123_vm0 = vmmov 0   ;;  %v124_v3 = vmov 0.0   ;;  %vm24_vm1 = vcmask 130048   ;;  %s160_s1 = inlined_call_operand.vmem [shape: f32[16,8], index: 1, kind: input, shape index: {}]   ;;  %s161_s0 = inlined_call_operand.vmem [shape: f32[2,16], index: 0, kind: input, shape index: {}]   ;;  %s162_s2 = inlined_call_operand.vmem [shape: f32[1,8], index: 2, kind: input, shape index: {}]   ;;  %s163_s3 = inlined_call_operand.vmem [shape: f32[2,8], index: 3, kind: output, shape index: {}]  }
   0x1   :  { %116 = vmatprep.subr.bf16.mxu0 %v122_v0  ;;  %v15_v1 = vld [vmem:[%s160_s1] sm:$0xff]  ;;  %v16_v2 = vld [vmem:[%s160_s1 + $0x8] sm:$0xff]  ;;  %113 = vmatprep.mubr.msk.f32.mxu0 %vm123_vm0, %v124_v3  ;;  %vm98_vm2 = vcmask 58368  }
   0x2   :  { %v117_v4 = vpack.c.bf16 %v16_v2, %v15_v1  ;;  %v14_v5 = vld [vmem:[%s161_s0] sm:$0x3] }
   0x3   :  { %v104_v6 = vld [vmem:[%s162_s2] ss:$0 sm:$0xff] }
   0x4   :  { %118 = vmatpush3.bf16.msra.mxu0 %v117_v4 }
   0x7   :  { %114 = vmatmul.mubr.msk.f32.vlgmr.msra.gmra.mrb[0].mxu0 %vm24_vm1, %v14_v5 }
  0xda   :  { %v94_v7 = vpop.f32.mrb[0].mxu0 }
  0xdb   :  { %v95_v8 = vadd.f32 %v104_v6, %v94_v7  ;;  %v115_v9 = vpop.f32.mrb[1].mxu0 }
  0xdd   :  { %99 = vst.msk [vmem:[%s163_s3] sm:$0x3] %vm98_vm2, %v95_v8 }

// kernel: adaptive_instance_norm.3
= control target key start
LH: loop header
LB: loop body
LE: loop exit
PB: predicated region body
PF: predicated region fallthrough
CT: control target
= control target key end

     0   :  { %8 = vsyncpa [#allocation3], 0  ;;  %s751_s0 = inlined_call_operand.vmem [shape: f32[2,4,256], index: 0, kind: input, shape index: {}]   ;;  %s752_s1 = inlined_call_operand.vmem [shape: f32[2,4,1], index: 1, kind: input, shape index: {}]   ;;  %s753_s2 = inlined_call_operand.vmem [shape: f32[2,4,1], index: 2, kind: input, shape index: {}]   ;;  %s754_s3 = inlined_call_operand.hbm [shape: f32[2,4,256], index: 3, kind: output, shape index: {}]  }
   0x1   :  { %10 = vsyncpa [#allocation3 + $0x1], 0  ;;  %s629_s12 = smov 0   ;;  %s631_s13 = smov 0  }
   0x2   :  { %s633_s14 = smov 0   ;;  %s635_s15 = smov 0  }
   0x3   :  { %s637_s16 = smov 0   ;;  %s639_s17 = smov 0  }
   0x4 LB: > { %s447_s18 = sadd.s32 4294967295, %s604_s17   ;;  %s448_s19 = sadd.s32 4294967294, %s604_s17   ;;  %s604_s17 = sphi %s639_s17, %s16_s17   ;;  %s600_s16 = sphi %s637_s16, %s761_s16   ;;  %s596_s15 = sphi %s635_s15, %s760_s15   ;;  %s592_s14 = sphi %s633_s14, %s759_s14   ;;  %s588_s13 = sphi %s631_s13, %s758_s13   ;;  %s584_s12 = sphi %s629_s12, %s757_s12  }
   0x5   : > { %s28_s20 = sadd.s32 1, %s600_s16  ;;  %s121_s21 = sadd.s32 1, %s592_s14 }
   0x6   : > { %p30_p0 = scmp.ge.s32.totalorder %s28_s20, 2  ;;  %p131_p1 = scmp.ne.s32.totalorder %s592_s14, %s588_s13 }
   0x7   : > { %p132_p2 = scmp.eq.s32.totalorder %s447_s18, 1  ;;  %p137_p3 = scmp.ne.s32.totalorder %s588_s13, %s584_s12 }
   0x8   : > { %s763_s20 = smov (%p30_p0, %s28_s20), 0  ;;  %p138_p5 = scmp.eq.s32.totalorder %s448_s19, 1 }
   0x9   : > { %p669_p4 = por %p132_p2, %p131_p1  ;;  %s116_s23 = ssub.s32 %s600_s16, %s763_s20 }
   0xa   : > { %p451_p6 = scmp.ge.s32.totalorder %s604_s17, 1  ;;  %p119_p7 = scmp.eq.s32.totalorder %s116_s23, 0 }
   0xb   : > { %p676_p8 = por %p138_p5, %p137_p3  ;;  %p188_p9 = scmp.lt.s32.totalorder %s604_s17, 3 }
   0xc   : > { %s682_s25 = scalar_select %p119_p7, %s592_s14, %s121_s21  }
   0xd   : > { %p189_p10 = pnand %p451_p6, %p188_p9 }
   0xe   : > { %p230_p11 = scmp.lt.s32.totalorder (!%p189_p10), %s596_s15, 1  ;;  %vm257_vm0 = vcmask (!%p189_p10), 1043456   ;;  %v606_v5 = vmov (!%p189_p10), 0   ;;  %v607_v8 = vmov (!%p189_p10), 839922192   ;;  %v269_v10 = vlaneseq (!%p189_p10)  ;;  %s227_s11 = sand.u32 (!%p189_p10), 1, %s588_s13  }
   0xf   : > { %192 = sbr.rel (%p189_p10) target bundleno = 370 (0x172), region = 32  ;;  %521 = vset.pattern.permute.xlu1 (!%p189_p10), %v606_v5  ;;  %522 = vset.pattern.permute.xlu0 (!%p189_p10), %v606_v5  ;;  %v267_v9 = vunpack.c.l.s4 (!%p189_p10), %v607_v8  ;;  %s452_s18 = sshll.u32 (!%p189_p10), %s227_s11, 3 }
  0x10   : > { %v270_v12 = vshrl.u32 (!%p189_p10), %v269_v10, 7  ;;  %s463_s19 = sshll.u32 (!%p189_p10), %s596_s15, 7  ;;  %s229_s21 = scalar_lea.vmem (!%p189_p10), [#allocation2], %s452_s18 }
  0x11   : > { %v268_v11 = vunpack.c.0.s8 (!%p189_p10), %v267_v9  ;;  %s338_s23 = sshll.u32 (!%p189_p10), %s229_s21, 4  ;;  %s704_s28 = scalar_lea.hbm (!%p189_p10), %s754_s3, %s463_s19  ;;  %s706_s23 = int_to_ptr.vmem [resolvable:$true] %s338_s23 }
  0x12   : > { %s322_s29 = scalar_lea.sflag (!%p189_p10), [#allocation3], %s227_s11 }
  0x13   : > { %v271_v13 = vsub.s32 (!%p189_p10), %v268_v11, %v270_v12 }
  0x16   : > { %s231_s26 = scalar_select %p230_p11, %s596_s15, 1 }
  0x17   : > { %s608_s15 = smov [#allocation2]  }
  0x18   : > { %s462_s27 = sshll.u32 %s231_s26, 3  ;;  %s455_s4 = sshll.u32 %s231_s26, 2 }
  0x19   : > { %s238_s30 = scalar_lea.vmem %s751_s0, %s462_s27  ;;  %s245_s7 = scalar_lea.vmem %s752_s1, %s455_s4 }
  0x1a   : > { %v253_v0 = vld [vmem:[%s238_s30] sm:$0xff]  ;;  %s252_s10 = scalar_lea.vmem %s753_s2, %s455_s4  ;;  %s526_s30 = scalar_lea.vmem %s706_s23, 128 }
  0x1b   : > { %v255_v1 = vcombine.high %v253_v0, %v253_v0  ;;  %v258_v2 = vsel %vm257_vm0, %v253_v0, 0.0  ;;  %v297_v6 = vld [vmem:[%s245_s7] sm:$0xf]  ;;  %p527_p12 = scmp.ne.s32.totalorder %s706_s23, %s526_s30  ;;  %s530_s4 = sshll.u32 %s608_s15, 4  ;;  %s531_s4 = int_to_ptr.vmem [resolvable:$false] %s530_s4 }
  0x1c   : > { %300 = vperm.xlu1 %521, %v297_v6   ;;  %v308_v7 = vld [vmem:[%s252_s10] sm:$0xf]  ;;  %s532_s5 = scalar_lea.vmem %s531_s4, 256  ;;  %p533_p1 = scmp.lt.s32.totalorder %s706_s23, %s531_s4 }
  0x1d   : > { %v259_v3 = vsel %vm257_vm0, %v255_v1, 0.0  ;;  %p528_p13 = pnand %p527_p12, %p669_p4  ;;  %p534_p2 = scmp.lt.s32.totalorder %s532_s5, %s526_s30 }
  0x1e   : > { %v260_v4 = vadd.f32 %v259_v3, %v258_v2 }
  0x1f   : > { %p529_p0 = pneg %p528_p13  ;;  %p535_p3 = por %p534_p2, %p533_p1 }
  0x20   : > { %261 = vadd.xlane.f32.xlu0 %v260_v4  ;;  %311 = vperm.xlu1 %521, %v308_v7  }
  0x21   : > { %p536_p5 = pnand %p535_p3, %p529_p0 }
  0x9b   : > { %v301_v28 = vpop.permute.xlu1 %300 }
  0x9f   : > { %v312_v33 = vpop.permute.xlu1 %311 }
  0xad   : > { %v262_v14 = vpop.xlane.xlu0 %261 }
  0xae   : > { %v264_v15 = vmul.f32 0.00390625, %v262_v14 }
  0xb0   : > { %v272_v16 = vrot.slane %v264_v15, %v271_v13 }
  0xb2   : > { %v274_v17 = vsub.f32 %v253_v0, %v272_v16 }
  0xb4   : > { %v275_v18 = vmul.f32 %v274_v17, %v274_v17 }
  0xb6   : > { %v277_v19 = vcombine.high %v275_v18, %v275_v18  ;;  %v279_v20 = vsel %vm257_vm0, %v275_v18, 0.0 }
  0xb8   : > { %v280_v21 = vsel %vm257_vm0, %v277_v19, 0.0 }
  0xb9   : > { %v281_v22 = vadd.f32 %v280_v21, %v279_v20 }
  0xbb   : > { %282 = vadd.xlane.f32.xlu0 %v281_v22 }
 0x148   : > { %v283_v23 = vpop.xlane.xlu0 %282 }
 0x149   : > { %v284_v24 = vmul.f32 0.00390625, %v283_v23 }
 0x14b   : > { %v285_v25 = vadd.f32 1e-05, %v284_v24 }
 0x14d   : > { %524 = vrsqrt.f32 %v285_v25 }
 0x157   : > { %v525_v26 = vpop.eup %524 }
 0x158   : > { %v294_v27 = vrot.slane %v525_v26, %v271_v13 }
 0x15a   : > { %v296_v29 = vmul.f32 %v294_v27, %v274_v17 }
 0x15c   : > { %v304_v30 = vcombine.high %v296_v29, %v296_v29  ;;  %v306_v31 = vmul.f32 %v301_v28, %v296_v29 }
 0x15e   : > { %v307_v32 = vmul.f32 %v304_v30, %v301_v28  ;;  %v314_v34 = vadd.f32 %v312_v33, %v306_v31 }
 0x160   : > { %v315_v35 = vadd.f32 %v312_v33, %v307_v32 }
 0x162   : > { %v318_v36 = vcombine.low %v314_v34, %v315_v35 }
 0x164   : > { %320 = vst [vmem:[%s229_s21] sm:$0xff] %v318_v36 }
 0x165   : > { %539 = shalt.err (!%p536_p5)
}
 0x166   : > { %s540_s6 = scalar_lea.hbm %s704_s28, 128  ;;  %s544_s9 = scalar_lea.hbm %s754_s3, 256 }
 0x167   : > { %p541_p6 = scmp.ne.s32.totalorder %s704_s28, %s540_s6  ;;  %p545_p10 = scmp.lt.u32.totalorder %s704_s28, %s754_s3 }
 0x168   : > { %p546_p11 = scmp.lt.u32.totalorder %s544_s9, %s540_s6  ;;  %p548_p13 = scmp.lt.u32.totalorder %s540_s6, %s704_s28 }
 0x169   : > { %p542_p7 = pnand %p541_p6, %p669_p4 }
 0x16a   : > { %p547_p12 = por %p546_p11, %p545_p10 }
 0x16b   : > { %p543_p9 = pneg %p542_p7 }
 0x16c   : > { %p549_p0 = por %p548_p13, %p547_p12 }
 0x16e   : > { %p550_p1 = pnand %p549_p0, %p543_p9 }
 0x170   : > { %553 = shalt.err (!%p550_p1)
}
 0x171   : > { %464 = dma.vmem_to_hbm [thread:$0]  (%p669_p4), %s706_s23, 128, %s704_s28, %s322_s29  }
 0x172 PF: > { %p470_p2 = scmp.ge.s32.totalorder %s604_s17, 2  ;;  %s350_s18 = sand.u32 1, %s584_s12  }
 0x173   : > { %s351_s19 = scalar_lea.sflag [#allocation3], %s350_s18 }
 0x174   : > { %p467_p3 = pnand %p470_p2, %p676_p8 }
 0x176   : > { %579 = dma.done.wait (!%p467_p3), %s351_s19, 128  }
 0x177   : > { %581 = vsyncadd (!%p467_p3), %s351_s19, 4294967168  ;;  %s16_s17 = sadd.s32 1, %s604_s17   ;;  %s757_s12 = smov %s588_s13 }
 0x178   : > { %p13_p5 = scmp.ge.s32.totalorder %s16_s17, 4   ;;  %s758_s13 = smov %s592_s14 }
 0x179   : > { %s759_s14 = smov %s682_s25  ;;  %s760_s15 = smov %s600_s16 }
 0x17a   : > { %s761_s16 = smov %s763_s20  ;;  %15 = sbr.rel (!%p13_p5) target bundleno = 4 (0x4), region = 73 }
 0x181   :  { %356 = vsyncpa [#allocation3], 1 }
 0x182   :  { %358 = vsyncpa [#allocation3 + $0x1], 1 }

</bundles_post_ra>
